<compile_context>
chip_gen: v7x
topology: tpu7x:2x2x1
jax: 0.10.0
libtpu: 0.0.40
codegen_flags: <defaults>
</compile_context>

<pallas_src>
import functools
from math import gcd

import jax
import jax.numpy as jnp
from jax import lax
from jax.experimental import pallas as pl
from jax.experimental.pallas import tpu as pltpu


def _round_up(a, b):
    return (a + b - 1) // b * b


def _tpu_core_info():
    """(TensorCores per chip, VMEM capacity bytes) with conservative fallbacks."""
    vmem_cap = 64 * 1024 * 1024   # v7x has the smallest VMEM; safe default
    n_cores = 1
    try:
        info = pltpu.get_tpu_info()
        vmem_cap = int(getattr(info, "vmem_capacity_bytes", vmem_cap))
    except Exception:
        pass
    try:
        kind = jax.devices()[0].device_kind.lower()
        if "v7" in kind:
            n_cores = 2           # v7x: 2 TensorCores per chip (megacore)
    except Exception:
        pass
    return n_cores, vmem_cap


def _pick_block_rows(N, per_row_stream_bytes, resident_bytes, n_cores, vmem_capacity):
    """Largest row tile that fits VMEM; split in >= 2 grid steps only on 2-TC chips."""
    budget = int(vmem_capacity * 0.75) - resident_bytes - (2 << 20)
    budget = max(budget, 1 << 20)
    max_rows = max(8, (budget // max(per_row_stream_bytes, 1)) // 8 * 8)
    max_rows = min(max_rows, 1024)        # 512-1024 rows already amortize per-step overhead
    if n_cores >= 2:
        rows = _round_up(pl.cdiv(N, 2), 8)   # keep >= 2 grid steps so both TCs get work
    else:
        rows = _round_up(N, 8)               # single TC: one maximal tile
    return max(8, min(rows, max_rows))


def linear_gn_relu_kernel(x_ref, w_ref, gamma_ref, beta_ref, s_ref, b_ref, o_ref,
                          *, act, eps, inv_cpg):
    """One batch tile (Nb rows) per grid step.

    x_ref:     (Nb, n_in)              bf16 input rows
    w_ref:     (n_in, n_out_pad)       bf16 weight (transposed from PyTorch (n_out, n_in))
    gamma_ref: (1, n_out_pad)          f32 GroupNorm scale (0 on padded channels)
    beta_ref:  (1, n_out_pad)          f32 GroupNorm shift (0 on padded channels)
    s_ref:     (n_out_pad, groups_pad) f32 0/1 sum-to-group matrix
    b_ref:     (groups_pad, n_out_pad) f32 0/1 group-broadcast matrix
    o_ref:     (Nb, n_out_pad)         output rows (lane-dense)
    """
    # ---- Linear (bias=False): single bf16 MXU matmul, f32 accumulation ----
    acc = jnp.dot(x_ref[...], w_ref[...], preferred_element_type=jnp.float32)       # (Nb, n_out_pad)

    # ---- GroupNorm stats via factorized sum/broadcast matmuls (f32) ----
    gsum = jnp.dot(acc, s_ref[...], preferred_element_type=jnp.float32)             # (Nb, groups_pad)
    mean = jnp.dot(gsum * inv_cpg, b_ref[...], preferred_element_type=jnp.float32)  # (Nb, n_out_pad)
    centered = acc - mean
    # Variance from centered values (always >= 0; no E[x^2]-E[x]^2 cancellation).
    vsum = jnp.dot(centered * centered, s_ref[...], preferred_element_type=jnp.float32)
    var = jnp.dot(vsum * inv_cpg, b_ref[...], preferred_element_type=jnp.float32)

    # ---- Folded affine + fused ReLU ----
    scale = gamma_ref[...] * lax.rsqrt(var + eps)
    y = centered * scale + beta_ref[...]
    if act:
        y = jnp.maximum(y, 0.0)
    o_ref[...] = y.astype(o_ref.dtype)


def linear_gn_relu(x, weight_oi, gamma, beta, *, ng=32, act=True, eps=1e-5,
                   block_rows=None, mxu_dtype=jnp.bfloat16):
    """Forward pass of the `Linear` module (norm='GN').

    x:         (N, n_in)
    weight_oi: (n_out, n_in)   PyTorch nn.Linear weight layout
    gamma:     (n_out,)        GroupNorm weight
    beta:      (n_out,)        GroupNorm bias
    """
    N, n_in = x.shape
    n_out, n_in_w = weight_oi.shape
    assert n_in_w == n_in

    groups = gcd(ng, n_out)
    cpg = n_out // groups

    n_out_pad = _round_up(n_out, 128)     # lane-dense output tile
    groups_pad = _round_up(groups, 128)

    n_cores, vmem_cap = _tpu_core_info()
    out_dtype = x.dtype
    x_bytes = jnp.dtype(mxu_dtype).itemsize
    o_bytes = jnp.dtype(out_dtype).itemsize

    resident_bytes = (
        n_in * n_out_pad * x_bytes          # weight (single-buffered)
        + 2 * n_out_pad * 4                 # gamma, beta (f32)
        + 2 * n_out_pad * groups_pad * 4    # S and B (f32)
    )
    per_row_stream = 2 * n_in * x_bytes + 2 * n_out_pad * o_bytes   # double-buffered in/out

    if block_rows is None:
        block_rows = _pick_block_rows(N, per_row_stream, resident_bytes, n_cores, vmem_cap)
    Nb = _round_up(max(block_rows, 8), 8)
    Np = _round_up(N, Nb)

    # ---- one-time layout prep in plain JAX ----
    xp = x.astype(mxu_dtype)
    if Np != N:
        xp = jnp.pad(xp, ((0, Np - N), (0, 0)))
    w_io = jnp.transpose(weight_oi, (1, 0)).astype(mxu_dtype)              # (n_in, n_out)
    if n_out_pad != n_out:
        w_io = jnp.pad(w_io, ((0, 0), (0, n_out_pad - n_out)))
    gamma2 = jnp.pad(gamma.astype(jnp.float32), (0, n_out_pad - n_out)).reshape(1, n_out_pad)
    beta2 = jnp.pad(beta.astype(jnp.float32), (0, n_out_pad - n_out)).reshape(1, n_out_pad)

    # Factorized 0/1 group membership matrices; padded channels/groups contribute nothing.
    ch = jnp.arange(n_out_pad)
    grp = jnp.arange(groups_pad)
    member = ((ch // cpg)[:, None] == grp[None, :]) & (ch < n_out)[:, None] & (grp < groups)[None, :]
    s_mat = member.astype(jnp.float32)                  # (n_out_pad, groups_pad) sum-to-group
    b_mat = jnp.transpose(s_mat, (1, 0))                # (groups_pad, n_out_pad) broadcast

    vmem_needed = int(Nb * per_row_stream + resident_bytes)
    vmem_limit = int(min(max(32 << 20, int(vmem_needed * 1.5) + (2 << 20)),
                         max(vmem_cap, 32 << 20)))

    kernel = functools.partial(linear_gn_relu_kernel, act=act, eps=eps,
                               inv_cpg=1.0 / float(cpg))

    def _call(single_buffer_residents):
        const_kw = dict(pipeline_mode=pl.Buffered(1)) if single_buffer_residents else {}
        grid_spec = pltpu.PrefetchScalarGridSpec(
            num_scalar_prefetch=0,
            grid=(Np // Nb,),
            in_specs=[
                pl.BlockSpec((Nb, n_in), lambda i: (i, 0)),                         # x rows
                pl.BlockSpec((n_in, n_out_pad), lambda i: (0, 0), **const_kw),      # weight
                pl.BlockSpec((1, n_out_pad), lambda i: (0, 0), **const_kw),         # gamma
                pl.BlockSpec((1, n_out_pad), lambda i: (0, 0), **const_kw),         # beta
                pl.BlockSpec((n_out_pad, groups_pad), lambda i: (0, 0), **const_kw),  # S
                pl.BlockSpec((groups_pad, n_out_pad), lambda i: (0, 0), **const_kw),  # B
            ],
            out_specs=pl.BlockSpec((Nb, n_out_pad), lambda i: (i, 0)),
        )
        return pl.pallas_call(
            kernel,
            out_shape=jax.ShapeDtypeStruct((Np, n_out_pad), out_dtype),
            grid_spec=grid_spec,
            compiler_params=pltpu.CompilerParams(
                dimension_semantics=("parallel",),
                vmem_limit_bytes=vmem_limit,
            ),
        )(xp, w_io, gamma2, beta2, s_mat, b_mat)

    try:
        out = _call(True)
    except Exception:
        # Installed JAX rejected single-buffering of constants; default buffering.
        out = _call(False)

    return out[:N, :n_out]


def reference_forward(x, weight_oi, gamma, beta, *, ng=32, act=True, eps=1e-5,
                      mxu_dtype=jnp.bfloat16):
    """Pure-JAX reference matching PyTorch GN semantics.

    Linear inputs are quantized to the same MXU dtype as the kernel so the check
    isolates kernel correctness from the (intentional) bf16 input rounding.
    """
    n_out = weight_oi.shape[0]
    groups = gcd(ng, n_out)
    xq = x.astype(mxu_dtype).astype(jnp.float32)
    wq = weight_oi.astype(mxu_dtype).astype(jnp.float32)
    out = xq @ wq.T
    N = out.shape[0]
    g = out.reshape(N, groups, n_out // groups)
    mu = jnp.mean(g, axis=2, keepdims=True)
    var = jnp.mean((g - mu) ** 2, axis=2, keepdims=True)
    g = (g - mu) / jnp.sqrt(var + eps)
    out = g.reshape(N, n_out) * gamma.reshape(1, n_out) + beta.reshape(1, n_out)
    if act:
        out = jnp.maximum(out, 0.0)
    return out.astype(x.dtype)


if __name__ == "__main__":
    # Module config: Linear(n_in=32, n_out=64, bias=False)
    #   -> GroupNorm(gcd(32, 64) = 32 groups, 2 channels/group) -> ReLU
    N, n_in, n_out = 16, 32, 64

    key = jax.random.PRNGKey(0)
    kx, kw, kg, kb = jax.random.split(key, 4)
    x = jax.random.normal(kx, (N, n_in), dtype=jnp.float32)
    weight = 0.1 * jax.random.normal(kw, (n_out, n_in), dtype=jnp.float32)   # PyTorch (out, in)
    gamma = 1.0 + 0.1 * jax.random.normal(kg, (n_out,), dtype=jnp.float32)
    beta = 0.1 * jax.random.normal(kb, (n_out,), dtype=jnp.float32)

    out = linear_gn_relu(x, weight, gamma, beta, ng=32, act=True)
    out = jax.block_until_ready(out)

    ref = reference_forward(x, weight, gamma, beta, ng=32, act=True)
    assert out.shape == (N, n_out)
    assert bool(jnp.all(jnp.isfinite(out)))
    assert jnp.allclose(out, ref, rtol=2e-2, atol=2e-2), "mismatch vs reference"

    print("KERNEL_OK")
</pallas_src>

<mosaic_0001>
module attributes {stable_mosaic.version = 11 : i64} {
  func.func @linear_gn_relu_kernel(%arg0: i32, %arg1: memref<16x32xbf16, #tpu.memory_space<vmem>>, %arg2: memref<32x128xbf16, #tpu.memory_space<vmem>>, %arg3: memref<1x128xf32, #tpu.memory_space<vmem>>, %arg4: memref<1x128xf32, #tpu.memory_space<vmem>>, %arg5: memref<128x128xf32, #tpu.memory_space<vmem>>, %arg6: memref<128x128xf32, #tpu.memory_space<vmem>>, %arg7: memref<16x128xf32, #tpu.memory_space<vmem>>) attributes {dimension_semantics = [#tpu.dimension_semantics<parallel>], iteration_bounds = array<i64: 1>, scalar_prefetch = 0 : i64, scratch_operands = 0 : i64, tpu.core_type = #tpu.core_type<tc>, window_params = [{transform_indices = @transform_0, window_bounds = array<i64: 16, 32>}, {pipeline_mode = #tpu.pipeline_mode<synchronous>, transform_indices = @transform_1, window_bounds = array<i64: 32, 128>}, {pipeline_mode = #tpu.pipeline_mode<synchronous>, transform_indices = @transform_2, window_bounds = array<i64: 1, 128>}, {pipeline_mode = #tpu.pipeline_mode<synchronous>, transform_indices = @transform_3, window_bounds = array<i64: 1, 128>}, {pipeline_mode = #tpu.pipeline_mode<synchronous>, transform_indices = @transform_4, window_bounds = array<i64: 128, 128>}, {pipeline_mode = #tpu.pipeline_mode<synchronous>, transform_indices = @transform_5, window_bounds = array<i64: 128, 128>}, {transform_indices = @transform_6, window_bounds = array<i64: 16, 128>}]} {
    %c0 = arith.constant 0 : index
    %c0_0 = arith.constant 0 : index
    %0 = vector.load %arg1[%c0, %c0_0] : memref<16x32xbf16, #tpu.memory_space<vmem>>, vector<16x32xbf16>
    %c0_1 = arith.constant 0 : index
    %c0_2 = arith.constant 0 : index
    %1 = vector.load %arg2[%c0_1, %c0_2] : memref<32x128xbf16, #tpu.memory_space<vmem>>, vector<32x128xbf16>
    %cst = arith.constant dense<0.000000e+00> : vector<16x128xf32>
    %2 = tpu.matmul %0, %1, %cst {dimension_numbers = #tpu.dot_dimension_numbers<[1], [0], [0], [1], [0, 0, 1, 1], [], []>} : vector<16x32xbf16>, vector<32x128xbf16>, vector<16x128xf32> -> vector<16x128xf32>
    %c0_3 = arith.constant 0 : index
    %c0_4 = arith.constant 0 : index
    %3 = vector.load %arg5[%c0_3, %c0_4] : memref<128x128xf32, #tpu.memory_space<vmem>>, vector<128x128xf32>
    %cst_5 = arith.constant dense<0.000000e+00> : vector<16x128xf32>
    %4 = tpu.matmul %2, %3, %cst_5 {dimension_numbers = #tpu.dot_dimension_numbers<[1], [0], [0], [1], [0, 0, 1, 1], [], []>} : vector<16x128xf32>, vector<128x128xf32>, vector<16x128xf32> -> vector<16x128xf32>
    %cst_6 = arith.constant 5.000000e-01 : f32
    %5 = vector.broadcast %cst_6 : f32 to vector<16x128xf32>
    %6 = arith.mulf %4, %5 : vector<16x128xf32>
    %c0_7 = arith.constant 0 : index
    %c0_8 = arith.constant 0 : index
    %7 = vector.load %arg6[%c0_7, %c0_8] : memref<128x128xf32, #tpu.memory_space<vmem>>, vector<128x128xf32>
    %cst_9 = arith.constant dense<0.000000e+00> : vector<16x128xf32>
    %8 = tpu.matmul %6, %7, %cst_9 {dimension_numbers = #tpu.dot_dimension_numbers<[1], [0], [0], [1], [0, 0, 1, 1], [], []>} : vector<16x128xf32>, vector<128x128xf32>, vector<16x128xf32> -> vector<16x128xf32>
    %9 = arith.subf %2, %8 : vector<16x128xf32>
    %10 = arith.mulf %9, %9 : vector<16x128xf32>
    %c0_10 = arith.constant 0 : index
    %c0_11 = arith.constant 0 : index
    %11 = vector.load %arg5[%c0_10, %c0_11] : memref<128x128xf32, #tpu.memory_space<vmem>>, vector<128x128xf32>
    %cst_12 = arith.constant dense<0.000000e+00> : vector<16x128xf32>
    %12 = tpu.matmul %10, %11, %cst_12 {dimension_numbers = #tpu.dot_dimension_numbers<[1], [0], [0], [1], [0, 0, 1, 1], [], []>} : vector<16x128xf32>, vector<128x128xf32>, vector<16x128xf32> -> vector<16x128xf32>
    %cst_13 = arith.constant 5.000000e-01 : f32
    %13 = vector.broadcast %cst_13 : f32 to vector<16x128xf32>
    %14 = arith.mulf %12, %13 : vector<16x128xf32>
    %c0_14 = arith.constant 0 : index
    %c0_15 = arith.constant 0 : index
    %15 = vector.load %arg6[%c0_14, %c0_15] : memref<128x128xf32, #tpu.memory_space<vmem>>, vector<128x128xf32>
    %cst_16 = arith.constant dense<0.000000e+00> : vector<16x128xf32>
    %16 = tpu.matmul %14, %15, %cst_16 {dimension_numbers = #tpu.dot_dimension_numbers<[1], [0], [0], [1], [0, 0, 1, 1], [], []>} : vector<16x128xf32>, vector<128x128xf32>, vector<16x128xf32> -> vector<16x128xf32>
    %c0_17 = arith.constant 0 : index
    %c0_18 = arith.constant 0 : index
    %17 = vector.load %arg3[%c0_17, %c0_18] : memref<1x128xf32, #tpu.memory_space<vmem>>, vector<1x128xf32>
    %cst_19 = arith.constant 9.99999974E-6 : f32
    %18 = vector.broadcast %cst_19 : f32 to vector<16x128xf32>
    %19 = arith.addf %16, %18 : vector<16x128xf32>
    %20 = math.rsqrt %19 : vector<16x128xf32>
    %21 = vector.broadcast %17 : vector<1x128xf32> to vector<16x128xf32>
    %22 = arith.mulf %21, %20 : vector<16x128xf32>
    %23 = arith.mulf %9, %22 : vector<16x128xf32>
    %c0_20 = arith.constant 0 : index
    %c0_21 = arith.constant 0 : index
    %24 = vector.load %arg4[%c0_20, %c0_21] : memref<1x128xf32, #tpu.memory_space<vmem>>, vector<1x128xf32>
    %25 = vector.broadcast %24 : vector<1x128xf32> to vector<16x128xf32>
    %26 = arith.addf %23, %25 : vector<16x128xf32>
    %cst_22 = arith.constant 0.000000e+00 : f32
    %27 = vector.broadcast %cst_22 : f32 to vector<16x128xf32>
    %28 = arith.maximumf %26, %27 : vector<16x128xf32>
    %c0_23 = arith.constant 0 : index
    %c0_24 = arith.constant 0 : index
    %29 = vector.load %arg7[%c0_23, %c0_24] : memref<16x128xf32, #tpu.memory_space<vmem>>, vector<16x128xf32>
    tpu.vector_store %arg7[%c0_23, %c0_24], %28 {strides = array<i32>} : memref<16x128xf32, #tpu.memory_space<vmem>>, vector<16x128xf32>,
    return
  }
  func.func @transform_0(%arg0: i32) -> (i32, i32) {
    %c0_i32 = arith.constant 0 : i32
    %c0_i32_0 = arith.constant 0 : i32
    return %arg0, %c0_i32 : i32, i32
  }
  func.func @transform_1(%arg0: i32) -> (i32, i32) {
    %c0_i32 = arith.constant 0 : i32
    %c0_i32_0 = arith.constant 0 : i32
    %c0_i32_1 = arith.constant 0 : i32
    return %c0_i32, %c0_i32_0 : i32, i32
  }
  func.func @transform_2(%arg0: i32) -> (i32, i32) {
    %c0_i32 = arith.constant 0 : i32
    %c0_i32_0 = arith.constant 0 : i32
    %c0_i32_1 = arith.constant 0 : i32
    return %c0_i32, %c0_i32_0 : i32, i32
  }
  func.func @transform_3(%arg0: i32) -> (i32, i32) {
    %c0_i32 = arith.constant 0 : i32
    %c0_i32_0 = arith.constant 0 : i32
    %c0_i32_1 = arith.constant 0 : i32
    return %c0_i32, %c0_i32_0 : i32, i32
  }
  func.func @transform_4(%arg0: i32) -> (i32, i32) {
    %c0_i32 = arith.constant 0 : i32
    %c0_i32_0 = arith.constant 0 : i32
    %c0_i32_1 = arith.constant 0 : i32
    return %c0_i32, %c0_i32_0 : i32, i32
  }
  func.func @transform_5(%arg0: i32) -> (i32, i32) {
    %c0_i32 = arith.constant 0 : i32
    %c0_i32_0 = arith.constant 0 : i32
    %c0_i32_1 = arith.constant 0 : i32
    return %c0_i32, %c0_i32_0 : i32, i32
  }
  func.func @transform_6(%arg0: i32) -> (i32, i32) {
    %c0_i32 = arith.constant 0 : i32
    %c0_i32_0 = arith.constant 0 : i32
    return %arg0, %c0_i32 : i32, i32
  }
}

module attributes {stable_mosaic.version = 11 : i64} {
  func.func @linear_gn_relu_kernel(%arg0: i32, %arg1: memref<16x32xbf16, #tpu.memory_space<vmem>>, %arg2: memref<32x128xbf16, #tpu.memory_space<vmem>>, %arg3: memref<1x128xf32, #tpu.memory_space<vmem>>, %arg4: memref<1x128xf32, #tpu.memory_space<vmem>>, %arg5: memref<128x128xf32, #tpu.memory_space<vmem>>, %arg6: memref<128x128xf32, #tpu.memory_space<vmem>>, %arg7: memref<16x128xf32, #tpu.memory_space<vmem>>) attributes {dimension_semantics = [#tpu.dimension_semantics<parallel>], iteration_bounds = array<i64: 1>, scalar_prefetch = 0 : i64, scratch_operands = 0 : i64, tpu.core_type = #tpu.core_type<tc>, window_params = [{transform_indices = @transform_0, window_bounds = array<i64: 16, 32>}, {pipeline_mode = #tpu.pipeline_mode<synchronous>, transform_indices = @transform_1, window_bounds = array<i64: 32, 128>}, {pipeline_mode = #tpu.pipeline_mode<synchronous>, transform_indices = @transform_2, window_bounds = array<i64: 1, 128>}, {pipeline_mode = #tpu.pipeline_mode<synchronous>, transform_indices = @transform_3, window_bounds = array<i64: 1, 128>}, {pipeline_mode = #tpu.pipeline_mode<synchronous>, transform_indices = @transform_4, window_bounds = array<i64: 128, 128>}, {pipeline_mode = #tpu.pipeline_mode<synchronous>, transform_indices = @transform_5, window_bounds = array<i64: 128, 128>}, {transform_indices = @transform_6, window_bounds = array<i64: 16, 128>}]} {
    %c0 = arith.constant 0 : index
    %c0_0 = arith.constant 0 : index
    %0 = vector.load %arg1[%c0, %c0_0] : memref<16x32xbf16, #tpu.memory_space<vmem>>, vector<16x32xbf16>
    %c0_1 = arith.constant 0 : index
    %c0_2 = arith.constant 0 : index
    %1 = vector.load %arg2[%c0_1, %c0_2] : memref<32x128xbf16, #tpu.memory_space<vmem>>, vector<32x128xbf16>
    %cst = arith.constant dense<0.000000e+00> : vector<16x128xf32>
    %2 = tpu.matmul %0, %1, %cst {dimension_numbers = #tpu.dot_dimension_numbers<[1], [0], [0], [1], [0, 0, 1, 1], [], []>} : vector<16x32xbf16>, vector<32x128xbf16>, vector<16x128xf32> -> vector<16x128xf32>
    %c0_3 = arith.constant 0 : index
    %c0_4 = arith.constant 0 : index
    %3 = vector.load %arg5[%c0_3, %c0_4] : memref<128x128xf32, #tpu.memory_space<vmem>>, vector<128x128xf32>
    %cst_5 = arith.constant dense<0.000000e+00> : vector<16x128xf32>
    %4 = tpu.matmul %2, %3, %cst_5 {dimension_numbers = #tpu.dot_dimension_numbers<[1], [0], [0], [1], [0, 0, 1, 1], [], []>} : vector<16x128xf32>, vector<128x128xf32>, vector<16x128xf32> -> vector<16x128xf32>
    %cst_6 = arith.constant 5.000000e-01 : f32
    %5 = vector.broadcast %cst_6 : f32 to vector<16x128xf32>
    %6 = arith.mulf %4, %5 : vector<16x128xf32>
    %c0_7 = arith.constant 0 : index
    %c0_8 = arith.constant 0 : index
    %7 = vector.load %arg6[%c0_7, %c0_8] : memref<128x128xf32, #tpu.memory_space<vmem>>, vector<128x128xf32>
    %cst_9 = arith.constant dense<0.000000e+00> : vector<16x128xf32>
    %8 = tpu.matmul %6, %7, %cst_9 {dimension_numbers = #tpu.dot_dimension_numbers<[1], [0], [0], [1], [0, 0, 1, 1], [], []>} : vector<16x128xf32>, vector<128x128xf32>, vector<16x128xf32> -> vector<16x128xf32>
    %9 = arith.subf %2, %8 : vector<16x128xf32>
    %10 = arith.mulf %9, %9 : vector<16x128xf32>
    %c0_10 = arith.constant 0 : index
    %c0_11 = arith.constant 0 : index
    %11 = vector.load %arg5[%c0_10, %c0_11] : memref<128x128xf32, #tpu.memory_space<vmem>>, vector<128x128xf32>
    %cst_12 = arith.constant dense<0.000000e+00> : vector<16x128xf32>
    %12 = tpu.matmul %10, %11, %cst_12 {dimension_numbers = #tpu.dot_dimension_numbers<[1], [0], [0], [1], [0, 0, 1, 1], [], []>} : vector<16x128xf32>, vector<128x128xf32>, vector<16x128xf32> -> vector<16x128xf32>
    %cst_13 = arith.constant 5.000000e-01 : f32
    %13 = vector.broadcast %cst_13 : f32 to vector<16x128xf32>
    %14 = arith.mulf %12, %13 : vector<16x128xf32>
    %c0_14 = arith.constant 0 : index
    %c0_15 = arith.constant 0 : index
    %15 = vector.load %arg6[%c0_14, %c0_15] : memref<128x128xf32, #tpu.memory_space<vmem>>, vector<128x128xf32>
    %cst_16 = arith.constant dense<0.000000e+00> : vector<16x128xf32>
    %16 = tpu.matmul %14, %15, %cst_16 {dimension_numbers = #tpu.dot_dimension_numbers<[1], [0], [0], [1], [0, 0, 1, 1], [], []>} : vector<16x128xf32>, vector<128x128xf32>, vector<16x128xf32> -> vector<16x128xf32>
    %c0_17 = arith.constant 0 : index
    %c0_18 = arith.constant 0 : index
    %17 = vector.load %arg3[%c0_17, %c0_18] : memref<1x128xf32, #tpu.memory_space<vmem>>, vector<1x128xf32>
    %cst_19 = arith.constant 9.99999974E-6 : f32
    %18 = vector.broadcast %cst_19 : f32 to vector<16x128xf32>
    %19 = arith.addf %16, %18 : vector<16x128xf32>
    %20 = math.rsqrt %19 : vector<16x128xf32>
    %21 = vector.broadcast %17 : vector<1x128xf32> to vector<16x128xf32>
    %22 = arith.mulf %21, %20 : vector<16x128xf32>
    %23 = arith.mulf %9, %22 : vector<16x128xf32>
    %c0_20 = arith.constant 0 : index
    %c0_21 = arith.constant 0 : index
    %24 = vector.load %arg4[%c0_20, %c0_21] : memref<1x128xf32, #tpu.memory_space<vmem>>, vector<1x128xf32>
    %25 = vector.broadcast %24 : vector<1x128xf32> to vector<16x128xf32>
    %26 = arith.addf %23, %25 : vector<16x128xf32>
    %cst_22 = arith.constant 0.000000e+00 : f32
    %27 = vector.broadcast %cst_22 : f32 to vector<16x128xf32>
    %28 = arith.maximumf %26, %27 : vector<16x128xf32>
    %c0_23 = arith.constant 0 : index
    %c0_24 = arith.constant 0 : index
    %29 = vector.load %arg7[%c0_23, %c0_24] : memref<16x128xf32, #tpu.memory_space<vmem>>, vector<16x128xf32>
    tpu.vector_store %arg7[%c0_23, %c0_24], %28 {strides = array<i32>} : memref<16x128xf32, #tpu.memory_space<vmem>>, vector<16x128xf32>,
    return
  }
  func.func @transform_0(%arg0: i32) -> (i32, i32) {
    %c0_i32 = arith.constant 0 : i32
    %c0_i32_0 = arith.constant 0 : i32
    return %arg0, %c0_i32 : i32, i32
  }
  func.func @transform_1(%arg0: i32) -> (i32, i32) {
    %c0_i32 = arith.constant 0 : i32
    %c0_i32_0 = arith.constant 0 : i32
    %c0_i32_1 = arith.constant 0 : i32
    return %c0_i32, %c0_i32_0 : i32, i32
  }
  func.func @transform_2(%arg0: i32) -> (i32, i32) {
    %c0_i32 = arith.constant 0 : i32
    %c0_i32_0 = arith.constant 0 : i32
    %c0_i32_1 = arith.constant 0 : i32
    return %c0_i32, %c0_i32_0 : i32, i32
  }
  func.func @transform_3(%arg0: i32) -> (i32, i32) {
    %c0_i32 = arith.constant 0 : i32
    %c0_i32_0 = arith.constant 0 : i32
    %c0_i32_1 = arith.constant 0 : i32
    return %c0_i32, %c0_i32_0 : i32, i32
  }
  func.func @transform_4(%arg0: i32) -> (i32, i32) {
    %c0_i32 = arith.constant 0 : i32
    %c0_i32_0 = arith.constant 0 : i32
    %c0_i32_1 = arith.constant 0 : i32
    return %c0_i32, %c0_i32_0 : i32, i32
  }
  func.func @transform_5(%arg0: i32) -> (i32, i32) {
    %c0_i32 = arith.constant 0 : i32
    %c0_i32_0 = arith.constant 0 : i32
    %c0_i32_1 = arith.constant 0 : i32
    return %c0_i32, %c0_i32_0 : i32, i32
  }
  func.func @transform_6(%arg0: i32) -> (i32, i32) {
    %c0_i32 = arith.constant 0 : i32
    %c0_i32_0 = arith.constant 0 : i32
    return %arg0, %c0_i32 : i32, i32
  }
}

</mosaic_0001>

<bundles_post_ra>
// kernel: tpu_custom_call.1
= control target key start
LH: loop header
LB: loop body
LE: loop exit
PB: predicated region body
PF: predicated region fallthrough
CT: control target
= control target key end

     0   :  { %11 = vsyncpa [#allocation3], 0  ;;  %s1202_s0 = inlined_call_operand.hbm [shape: bf16[16,32], index: 0, kind: input, shape index: {}]   ;;  %s1203_s1 = inlined_call_operand.hbm [shape: bf16[32,128], index: 1, kind: input, shape index: {}]   ;;  %s1204_s2 = inlined_call_operand.vmem [shape: f32[1,128], index: 2, kind: input, shape index: {}]   ;;  %s1205_s3 = inlined_call_operand.vmem [shape: f32[1,128], index: 3, kind: input, shape index: {}]   ;;  %s1206_s4 = inlined_call_operand.hbm [shape: f32[128,128], index: 4, kind: input, shape index: {}]   ;;  %s1207_s5 = inlined_call_operand.hbm [shape: f32[128,128], index: 5, kind: input, shape index: {}]   ;;  %s1208_s6 = inlined_call_operand.hbm [shape: f32[16,128], index: 6, kind: output, shape index: {}]  }
   0x1   :  { %12 = vsyncpa [#allocation6], 0 }
   0x2   :  { %13 = vsyncpa [#allocation9], 0 }
   0x3   :  { %14 = vsyncpa [#allocation4], 0  ;;  %s1026_s21 = smov [#allocation5]   ;;  %s1027_s23 = smov [#allocation2]  }
   0x4   :  { %s32_s22 = sshll.u32 %s1026_s21, 4  ;;  %s20_s24 = sshll.u32 %s1027_s23, 4  ;;  %s33_s22 = int_to_ptr.vmem [resolvable:$true] %s32_s22  ;;  %s1072_s24 = int_to_ptr.vmem [resolvable:$true] %s20_s24 }
   0x5   :  { %s908_s27 = scalar_lea.hbm %s1203_s1, 256 }
   0x6   :  { %p909_p0 = scmp.ne.s32.totalorder %s1203_s1, %s908_s27  ;;  %p912_p1 = scmp.lt.u32.totalorder %s908_s27, %s1203_s1 }
   0x8   :  { %p914_p2 = pnand %p912_p1, %p909_p0 }
   0xa   :  { %917 = shalt.err (!%p914_p2)
}
   0xb   :  { %s918_s8 = scalar_lea.vmem %s33_s22, 256  ;;  %p923_p4 = scmp.lt.s32.totalorder %s33_s22, %s33_s22 }
   0xc   :  { %p919_p3 = scmp.ne.s32.totalorder %s33_s22, %s918_s8  ;;  %p924_p5 = scmp.lt.s32.totalorder %s918_s8, %s918_s8 }
   0xe   :  { %p925_p6 = por %p924_p5, %p923_p4 }
  0x10   :  { %p926_p7 = pnand %p925_p6, %p919_p3 }
  0x12   :  { %929 = shalt.err (!%p926_p7)
}
  0x13   :  { %s1028_s9 = smov 64   ;;  %s1029_s10 = smov 4  }
  0x14   :  { %38 = dma.hbm_to_vmem [thread:$0]  %s1203_s1, 256, %s33_s22, [#allocation6], %s1028_s9, %s1028_s9, %s1029_s10  }
  0x15   :  { %s930_s15 = scalar_lea.hbm %s1202_s0, 128 }
  0x16   :  { %p931_p8 = scmp.ne.s32.totalorder %s1202_s0, %s930_s15  ;;  %p934_p9 = scmp.lt.u32.totalorder %s930_s15, %s1202_s0 }
  0x18   :  { %p936_p10 = pnand %p934_p9, %p931_p8 }
  0x1a   :  { %939 = shalt.err (!%p936_p10)
}
  0x1b   :  { %s940_s20 = scalar_lea.vmem %s1072_s24, 128  ;;  %p945_p12 = scmp.lt.s32.totalorder %s1072_s24, %s1072_s24 }
  0x1c   :  { %p941_p11 = scmp.ne.s32.totalorder %s1072_s24, %s940_s20  ;;  %p946_p13 = scmp.lt.s32.totalorder %s940_s20, %s940_s20 }
  0x1e   :  { %p947_p0 = por %p946_p13, %p945_p12 }
  0x20   :  { %p948_p1 = pnand %p947_p0, %p941_p11 }
  0x22   :  { %951 = shalt.err (!%p948_p1)
}
  0x23   :  { %26 = dma.hbm_to_vmem [thread:$0]  %s1202_s0, 128, %s1072_s24, [#allocation3], %s1028_s9, %s1028_s9, %s1029_s10  }
  0x24   :  { %s1030_s22 = smov [#allocation7]   ;;  %s952_s27 = scalar_lea.hbm %s1206_s4, 2048 }
  0x25   :  { %s48_s23 = sshll.u32 %s1030_s22, 4  ;;  %p953_p2 = scmp.ne.s32.totalorder %s1206_s4, %s952_s27  ;;  %s49_s23 = int_to_ptr.vmem [resolvable:$true] %s48_s23 }
  0x26   :  { %p956_p3 = scmp.lt.u32.totalorder %s952_s27, %s1206_s4 }
  0x28   :  { %p958_p4 = pnand %p956_p3, %p953_p2 }
  0x2a   :  { %961 = shalt.err (!%p958_p4)
}
  0x2b   :  { %s962_s8 = scalar_lea.vmem %s49_s23, 2048  ;;  %p967_p6 = scmp.lt.s32.totalorder %s49_s23, %s49_s23 }
  0x2c   :  { %p963_p5 = scmp.ne.s32.totalorder %s49_s23, %s962_s8  ;;  %p968_p7 = scmp.lt.s32.totalorder %s962_s8, %s962_s8 }
  0x2e   :  { %p969_p8 = por %p968_p7, %p967_p6 }
  0x30   :  { %p970_p9 = pnand %p969_p8, %p963_p5 }
  0x32   :  { %973 = shalt.err (!%p970_p9)
}
  0x33   :  { %s1031_s0 = smov 128   ;;  %s1032_s24 = smov 8  }
  0x34   :  { %54 = dma.hbm_to_vmem [thread:$0]  %s1206_s4, 2048, %s49_s23, [#allocation6], %s1031_s0, %s1031_s0, %s1032_s24  }
  0x35   :  { %s1033_s11 = smov [#allocation8]   ;;  %s974_s15 = scalar_lea.hbm %s1207_s5, 2048 }
  0x36   :  { %s60_s12 = sshll.u32 %s1033_s11, 4  ;;  %p975_p10 = scmp.ne.s32.totalorder %s1207_s5, %s974_s15  ;;  %s61_s12 = int_to_ptr.vmem [resolvable:$true] %s60_s12 }
  0x37   :  { %p978_p11 = scmp.lt.u32.totalorder %s974_s15, %s1207_s5 }
  0x39   :  { %p980_p12 = pnand %p978_p11, %p975_p10 }
  0x3b   :  { %983 = shalt.err (!%p980_p12)
}
  0x3c   :  { %s984_s20 = scalar_lea.vmem %s61_s12, 2048  ;;  %p989_p0 = scmp.lt.s32.totalorder %s61_s12, %s61_s12 }
  0x3d   :  { %p985_p13 = scmp.ne.s32.totalorder %s61_s12, %s984_s20  ;;  %p990_p1 = scmp.lt.s32.totalorder %s984_s20, %s984_s20 }
  0x3f   :  { %p991_p2 = por %p990_p1, %p989_p0 }
  0x41   :  { %p992_p3 = pnand %p991_p2, %p985_p13 }
  0x43   :  { %995 = shalt.err (!%p992_p3)
}
  0x44   :  { %66 = dma.hbm_to_vmem [thread:$0]  %s1207_s5, 2048, %s61_s12, [#allocation9], %s1031_s0, %s1031_s0, %s1032_s24  }
  0x45   :  { %1018 = dma.done.wait [#allocation3], 128  }
  0x46   :  { %1019 = vsyncadd [#allocation3], 4294967168 }
  0x47   :  { %1020 = dma.done.wait [#allocation6], 2304  }
  0x48   :  { %1021 = vsyncadd [#allocation6], 4294964992 }
  0x49   :  { %1022 = dma.done.wait [#allocation9], 2048  }
  0x4a   :  { %1023 = vsyncadd [#allocation9], 4294965248  ;;  %v1034_v0 = vmov 0.0   ;;  %vm1035_vm0 = vmmov 0   ;;  %v901_v1 = vld [vmem:[#allocation5] sm:$0xff]   ;;  %v902_v2 = vld [vmem:[#allocation5 + $0x8] sm:$0xff]  }
  0x4b   :  { %614 = vmatprep.subr.bf16.mxu0 %v1034_v0  ;;  %618 = vmatprep.mubr.msk.bf16.mxu0 %vm1035_vm0, %v1034_v0  ;;  %v148_v3 = vld [vmem:[#allocation7] sm:$0xff]  ;;  %v149_v4 = vld [vmem:[#allocation7 + $0x8] sm:$0xff]  ;;  %v150_v5 = vld [vmem:[#allocation7 + $0x10] sm:$0xff]  ;;  %vm103_vm1 = vcmask 261120   ;;  %s1036_s25 = smov [#allocation10]  }
  0x4c   :  { %615 = vmatpush3.bf16.msra.mxu0 %v901_v1  ;;  %v1133_v6 = vpack.c.bf16 %v149_v4, %v148_v3  ;;  %v151_v7 = vld [vmem:[#allocation7 + $0x18] sm:$0xff]  ;;  %v903_v8 = vld [vmem:[#allocation2] sm:$0xff]   ;;  %v152_v10 = vld [vmem:[#allocation7 + $0x20] sm:$0xff]  ;;  %s519_s26 = sshll.u32 %s1036_s25, 4  ;;  %s520_s26 = int_to_ptr.vmem [resolvable:$true] %s519_s26 }
  0x4d   :  { %616 = vmatprep.subr.bf16.mxu0 %v1034_v0  ;;  %v1135_v9 = vpack.c.bf16 %v151_v7, %v150_v5  ;;  %v153_v11 = vld [vmem:[#allocation7 + $0x28] sm:$0xff]  ;;  %v154_v13 = vld [vmem:[#allocation7 + $0x30] sm:$0xff]  ;;  %v155_v14 = vld [vmem:[#allocation7 + $0x38] sm:$0xff]  ;;  %p1001_p5 = scmp.lt.s32.totalorder %s520_s26, %s520_s26 }
  0x4e   :  { %763 = vmatprep.subr.bf16.mxu1 %v1133_v6  ;;  %v1140_v12 = vpack.c.bf16 %v153_v11, %v152_v10  ;;  %v1144_v15 = vpack.c.bf16 %v155_v14, %v154_v13  ;;  %v156_v16 = vld [vmem:[#allocation7 + $0x40] sm:$0xff]  ;;  %v157_v17 = vld [vmem:[#allocation7 + $0x48] sm:$0xff]  ;;  %v158_v19 = vld [vmem:[#allocation7 + $0x50] sm:$0xff] }
  0x4f   :  { %765 = vmatpush3.bf16.msra.mxu1 %v1133_v6  ;;  %v1148_v18 = vpack.c.bf16 %v157_v17, %v156_v16  ;;  %v159_v20 = vld [vmem:[#allocation7 + $0x58] sm:$0xff]  ;;  %v160_v22 = vld [vmem:[#allocation7 + $0x60] sm:$0xff]  ;;  %v161_v23 = vld [vmem:[#allocation7 + $0x68] sm:$0xff] }
  0x50   :  { %617 = vmatpush3.bf16.msra.mxu0 %v902_v2  ;;  %767 = vmatprep.subr.bf16.mxu1 %v1135_v9  ;;  %v1152_v21 = vpack.c.bf16 %v159_v20, %v158_v19  ;;  %v786_v24 = vpack.c.bf16 %v161_v23, %v160_v22  ;;  %v162_v25 = vld [vmem:[#allocation7 + $0x70] sm:$0xff]  ;;  %v163_v26 = vld [vmem:[#allocation7 + $0x78] sm:$0xff]  ;;  %v241_v28 = vld [vmem:[#allocation8] sm:$0xff] }
  0x51   :  { %v790_v27 = vpack.c.bf16 %v163_v26, %v162_v25  ;;  %v242_v29 = vld [vmem:[#allocation8 + $0x8] sm:$0xff]  ;;  %v243_v30 = vld [vmem:[#allocation8 + $0x10] sm:$0xff]  ;;  %v244_v32 = vld [vmem:[#allocation8 + $0x18] sm:$0xff] }
  0x52   :  { %v1158_v31 = vpack.c.bf16 %v242_v29, %v241_v28  ;;  %v1160_v33 = vpack.c.bf16 %v244_v32, %v243_v30  ;;  %v245_v34 = vld [vmem:[#allocation8 + $0x20] sm:$0xff]  ;;  %v246_v35 = vld [vmem:[#allocation8 + $0x28] sm:$0xff]  ;;  %v247_v37 = vld [vmem:[#allocation8 + $0x30] sm:$0xff] }
  0x53   :  { %619 = vmatmul.mubr.msk.bf16.vlgmr.msra.gmra.mrb[0].mxu0 %vm103_vm1, %v903_v8  ;;  %769 = vmatpush3.bf16.msra.mxu1 %v1135_v9  ;;  %v802_v36 = vpack.c.bf16 %v246_v35, %v245_v34  ;;  %v248_v38 = vld [vmem:[#allocation8 + $0x38] sm:$0xff]  ;;  %v249_v40 = vld [vmem:[#allocation8 + $0x40] sm:$0xff]  ;;  %v250_v41 = vld [vmem:[#allocation8 + $0x48] sm:$0xff] }
  0x54   :  { %771 = vmatprep.subr.bf16.mxu1 %v1140_v12  ;;  %795 = vmatprep.subr.bf16.mxu0 %v1158_v31  ;;  %v806_v39 = vpack.c.bf16 %v248_v38, %v247_v37  ;;  %v810_v42 = vpack.c.bf16 %v250_v41, %v249_v40  ;;  %v251_v43 = vld [vmem:[#allocation8 + $0x50] sm:$0xff]  ;;  %v252_v44 = vld [vmem:[#allocation8 + $0x58] sm:$0xff]  ;;  %v253_v46 = vld [vmem:[#allocation8 + $0x60] sm:$0xff] }
  0x55   :  { %797 = vmatpush3.bf16.msra.mxu0 %v1158_v31  ;;  %v814_v45 = vpack.c.bf16 %v252_v44, %v251_v43  ;;  %v254_v47 = vld [vmem:[#allocation8 + $0x68] sm:$0xff]  ;;  %v255_v53 = vld [vmem:[#allocation8 + $0x70] sm:$0xff]  ;;  %v256_v54 = vld [vmem:[#allocation8 + $0x78] sm:$0xff] }
  0x56   :  { %799 = vmatprep.subr.bf16.mxu0 %v1160_v33  ;;  %v818_v48 = vpack.c.bf16 %v254_v47, %v253_v46  ;;  %v822_v55 = vpack.c.bf16 %v256_v54, %v255_v53  ;;  %v537_v10 = vld [vmem:[%s1204_s2] ss:$0 sm:$0xff]  ;;  %s996_s2 = scalar_lea.vmem %s520_s26, 256 }
  0x57   :  { %773 = vmatpush3.bf16.msra.mxu1 %v1140_v12  ;;  %p997_p4 = scmp.ne.s32.totalorder %s520_s26, %s996_s2  ;;  %p1002_p6 = scmp.lt.s32.totalorder %s996_s2, %s996_s2 }
  0x58   :  { %775 = vmatprep.subr.bf16.mxu1 %v1144_v15 }
  0x59   :  { %801 = vmatpush3.bf16.msra.mxu0 %v1160_v33  ;;  %p1003_p7 = por %p1002_p6, %p1001_p5 }
  0x5a   :  { %803 = vmatprep.subr.bf16.mxu0 %v802_v36 }
  0x5b   :  { %777 = vmatpush3.bf16.msra.mxu1 %v1144_v15  ;;  %p1004_p8 = pnand %p1003_p7, %p997_p4 }
  0x5c   :  { %779 = vmatprep.subr.bf16.mxu1 %v1148_v18 }
  0x5d   :  { %805 = vmatpush3.bf16.msra.mxu0 %v802_v36 }
  0x5e   :  { %807 = vmatprep.subr.bf16.mxu0 %v806_v39 }
  0x5f   :  { %781 = vmatpush3.bf16.msra.mxu1 %v1148_v18 }
  0x60   :  { %783 = vmatprep.subr.bf16.mxu1 %v1152_v21 }
  0x61   :  { %809 = vmatpush3.bf16.msra.mxu0 %v806_v39 }
  0x62   :  { %811 = vmatprep.subr.bf16.mxu0 %v810_v42 }
  0x63   :  { %785 = vmatpush3.bf16.msra.mxu1 %v1152_v21 }
  0x64   :  { %787 = vmatprep.subr.bf16.mxu1 %v786_v24 }
  0x65   :  { %813 = vmatpush3.bf16.msra.mxu0 %v810_v42 }
  0x66   :  { %815 = vmatprep.subr.bf16.mxu0 %v814_v45 }
  0x67   :  { %789 = vmatpush3.bf16.msra.mxu1 %v786_v24 }
  0x68   :  { %791 = vmatprep.subr.bf16.mxu1 %v790_v27 }
  0x69   :  { %817 = vmatpush3.bf16.msra.mxu0 %v814_v45 }
  0x6a   :  { %819 = vmatprep.subr.bf16.mxu0 %v818_v48 }
  0x6b   :  { %793 = vmatpush3.bf16.msra.mxu1 %v790_v27 }
  0x6c   :  { %827 = vmatprep.subr.bf16.mxu1 %v1133_v6 }
  0x6d   :  { %821 = vmatpush3.bf16.msra.mxu0 %v818_v48 }
  0x6e   :  { %823 = vmatprep.subr.bf16.mxu0 %v822_v55 }
  0x71   :  { %825 = vmatpush3.bf16.msra.mxu0 %v822_v55 }
  0x72   :  { %859 = vmatprep.subr.bf16.mxu0 %v1158_v31 }
 0x126   :  { %v141_v49 = vpop.f32.mrb[0].mxu0 }
 0x127   :  { %v620_v50 = vpop.f32.mrb[1].mxu0  ;;  %654 = vmatprep.mubr.f32.mxu1 %v141_v49 }
 0x128   :  { %v144_v51 = vpop.f32.mrb[2].mxu0 }
 0x129   :  { %v621_v52 = vpop.f32.mrb[3].mxu0  ;;  %655 = vmatmul.mubr.f32.vlgmr.msra.gmra.mrb[0].mxu1 %v144_v51 }
 0x12a   :  { %829 = vmatpush3.bf16.msra.mxu1 %v1133_v6 }
 0x12b   :  { %831 = vmatprep.subr.bf16.mxu1 %v1135_v9 }
 0x12e   :  { %833 = vmatpush3.bf16.msra.mxu1 %v1135_v9 }
 0x12f   :  { %835 = vmatprep.subr.bf16.mxu1 %v1140_v12 }
 0x132   :  { %837 = vmatpush3.bf16.msra.mxu1 %v1140_v12 }
 0x133   :  { %839 = vmatprep.subr.bf16.mxu1 %v1144_v15 }
 0x136   :  { %841 = vmatpush3.bf16.msra.mxu1 %v1144_v15  ;;  %v538_v15 = vld [vmem:[%s1205_s3] ss:$0 sm:$0xff] }
 0x137   :  { %843 = vmatprep.subr.bf16.mxu1 %v1148_v18 }
 0x13a   :  { %845 = vmatpush3.bf16.msra.mxu1 %v1148_v18 }
 0x13b   :  { %847 = vmatprep.subr.bf16.mxu1 %v1152_v21 }
 0x13e   :  { %849 = vmatpush3.bf16.msra.mxu1 %v1152_v21 }
 0x13f   :  { %851 = vmatprep.subr.bf16.mxu1 %v786_v24 }
 0x142   :  { %853 = vmatpush3.bf16.msra.mxu1 %v786_v24 }
 0x143   :  { %855 = vmatprep.subr.bf16.mxu1 %v790_v27 }
 0x146   :  { %857 = vmatpush3.bf16.msra.mxu1 %v790_v27 }
 0x1fc   :  { %v656_v56 = vpop.f32.mrb[0].mxu1 }
 0x1fd   :  { %v230_v57 = vpop.f32.mrb[1].mxu1  ;;  %v240_v59 = vmul.f32 0.5, %v656_v56 }
 0x1fe   :  { %v239_v58 = vmul.f32 0.5, %v230_v57 }
 0x200   :  { %689 = vmatprep.mubr.f32.mxu0 %v239_v58 }
 0x201   :  { %690 = vmatmul.mubr.f32.vlgmr.msra.gmra.mrb[4].mxu0 %v240_v59 }
 0x202   :  { %861 = vmatpush3.bf16.msra.mxu0 %v1158_v31 }
 0x203   :  { %863 = vmatprep.subr.bf16.mxu0 %v1160_v33 }
 0x206   :  { %865 = vmatpush3.bf16.msra.mxu0 %v1160_v33 }
 0x207   :  { %867 = vmatprep.subr.bf16.mxu0 %v802_v36 }
 0x20a   :  { %869 = vmatpush3.bf16.msra.mxu0 %v802_v36 }
 0x20b   :  { %871 = vmatprep.subr.bf16.mxu0 %v806_v39 }
 0x20e   :  { %873 = vmatpush3.bf16.msra.mxu0 %v806_v39 }
 0x20f   :  { %875 = vmatprep.subr.bf16.mxu0 %v810_v42 }
 0x212   :  { %877 = vmatpush3.bf16.msra.mxu0 %v810_v42 }
 0x213   :  { %879 = vmatprep.subr.bf16.mxu0 %v814_v45 }
 0x216   :  { %881 = vmatpush3.bf16.msra.mxu0 %v814_v45 }
 0x217   :  { %883 = vmatprep.subr.bf16.mxu0 %v818_v48 }
 0x21a   :  { %885 = vmatpush3.bf16.msra.mxu0 %v818_v48 }
 0x21b   :  { %887 = vmatprep.subr.bf16.mxu0 %v822_v55 }
 0x21e   :  { %889 = vmatpush3.bf16.msra.mxu0 %v822_v55 }
 0x2d4   :  { %v691_v60 = vpop.f32.mrb[4].mxu0 }
 0x2d5   :  { %v333_v61 = vsub.f32 %v144_v51, %v691_v60  ;;  %v323_v62 = vpop.f32.mrb[5].mxu0 }
 0x2d6   :  { %v332_v63 = vsub.f32 %v141_v49, %v323_v62 }
 0x2d7   :  { %v335_v1 = vmul.f32 %v333_v61, %v333_v61 }
 0x2d8   :  { %v334_v0 = vmul.f32 %v332_v63, %v332_v63 }
 0x2da   :  { %724 = vmatprep.mubr.f32.mxu1 %v334_v0 }
 0x2db   :  { %725 = vmatmul.mubr.f32.vlgmr.msra.gmra.mrb[2].mxu1 %v335_v1 }
 0x3ae   :  { %v726_v2 = vpop.f32.mrb[2].mxu1 }
 0x3af   :  { %v402_v3 = vpop.f32.mrb[3].mxu1  ;;  %v412_v5 = vmul.f32 0.5, %v726_v2 }
 0x3b0   :  { %v411_v4 = vmul.f32 0.5, %v402_v3 }
 0x3b2   :  { %759 = vmatprep.mubr.f32.mxu0 %v411_v4 }
 0x3b3   :  { %760 = vmatmul.mubr.f32.vlgmr.msra.gmra.mrb[6].mxu0 %v412_v5 }
 0x486   :  { %v761_v6 = vpop.f32.mrb[6].mxu0 }
 0x487   :  { %v486_v7 = vadd.f32 1e-05, %v761_v6  ;;  %v480_v8 = vpop.f32.mrb[7].mxu0 }
 0x488   :  { %v481_v9 = vadd.f32 1e-05, %v480_v8 }
 0x489   :  { %904 = vrsqrt.f32 %v486_v7 }
 0x48a   :  { %906 = vrsqrt.f32 %v481_v9 }
 0x493   :  { %v905_v11 = vpop.eup %904 }
 0x494   :  { %v907_v12 = vpop.eup %906  ;;  %v498_v13 = vmul.f32 %v905_v11, %v537_v10 }
 0x495   :  { %v497_v14 = vmul.f32 %v907_v12, %v537_v10 }
 0x496   :  { %v500_v16 = vmul.f32 %v498_v13, %v333_v61 }
 0x497   :  { %v499_v17 = vmul.f32 %v497_v14, %v332_v63 }
 0x498   :  { %v509_v18 = vadd.f32 %v538_v15, %v500_v16 }
 0x499   :  { %v508_v19 = vadd.f32 %v538_v15, %v499_v17 }
 0x49a   :  { %v511_v20 = vmax.f32 %v509_v18, 0.0 }
 0x49b   :  { %v510_v21 = vmax.f32 %v508_v19, 0.0 }
 0x49c   :  { %513 = vst [vmem:[#allocation10 + $0x8] sm:$0xff] %v511_v20 }
 0x49d   :  { %512 = vst [vmem:[#allocation10] sm:$0xff] %v510_v21 }
 0x49e   :  { %1007 = shalt.err (!%p1004_p8)
}
 0x49f   :  { %s1008_s28 = scalar_lea.hbm %s1208_s6, 256 }
 0x4a0   :  { %p1009_p9 = scmp.ne.s32.totalorder %s1208_s6, %s1008_s28  ;;  %p1012_p10 = scmp.lt.u32.totalorder %s1008_s28, %s1208_s6 }
 0x4a2   :  { %p1014_p11 = pnand %p1012_p10, %p1009_p9 }
 0x4a4   :  { %1017 = shalt.err (!%p1014_p11)
}
 0x4a5   :  { %525 = dma.vmem_to_hbm [thread:$0]  %s520_s26, 256, %s1208_s6, [#allocation4], %s1031_s0, %s1031_s0, %s1032_s24  }
 0x4a6   :  { %1024 = dma.done.wait [#allocation4], 256  }
 0x4a7   :  { %1025 = vsyncadd [#allocation4], 4294967040 }
 0x4a8   :  { %529 = vsyncpa [#allocation3], 1 }
 0x4a9   :  { %530 = vsyncpa [#allocation6], 1 }
 0x4aa   :  { %531 = vsyncpa [#allocation9], 1 }
 0x4ab   :  { %532 = vsyncpa [#allocation4], 1 }

// kernel: tpu_custom_call.1
= control target key start
LH: loop header
LB: loop body
LE: loop exit
PB: predicated region body
PF: predicated region fallthrough
CT: control target
= control target key end

     0   :  { %11 = vsyncpa [#allocation3], 0  ;;  %s1202_s0 = inlined_call_operand.hbm [shape: bf16[16,32], index: 0, kind: input, shape index: {}]   ;;  %s1203_s1 = inlined_call_operand.hbm [shape: bf16[32,128], index: 1, kind: input, shape index: {}]   ;;  %s1204_s2 = inlined_call_operand.vmem [shape: f32[1,128], index: 2, kind: input, shape index: {}]   ;;  %s1205_s3 = inlined_call_operand.vmem [shape: f32[1,128], index: 3, kind: input, shape index: {}]   ;;  %s1206_s4 = inlined_call_operand.hbm [shape: f32[128,128], index: 4, kind: input, shape index: {}]   ;;  %s1207_s5 = inlined_call_operand.hbm [shape: f32[128,128], index: 5, kind: input, shape index: {}]   ;;  %s1208_s6 = inlined_call_operand.hbm [shape: f32[16,128], index: 6, kind: output, shape index: {}]  }
   0x1   :  { %12 = vsyncpa [#allocation6], 0 }
   0x2   :  { %13 = vsyncpa [#allocation9], 0 }
   0x3   :  { %14 = vsyncpa [#allocation4], 0  ;;  %s1026_s21 = smov [#allocation5]   ;;  %s1027_s23 = smov [#allocation2]  }
   0x4   :  { %s32_s22 = sshll.u32 %s1026_s21, 4  ;;  %s20_s24 = sshll.u32 %s1027_s23, 4  ;;  %s33_s22 = int_to_ptr.vmem [resolvable:$true] %s32_s22  ;;  %s1072_s24 = int_to_ptr.vmem [resolvable:$true] %s20_s24 }
   0x5   :  { %s908_s27 = scalar_lea.hbm %s1203_s1, 256 }
   0x6   :  { %p909_p0 = scmp.ne.s32.totalorder %s1203_s1, %s908_s27  ;;  %p912_p1 = scmp.lt.u32.totalorder %s908_s27, %s1203_s1 }
   0x8   :  { %p914_p2 = pnand %p912_p1, %p909_p0 }
   0xa   :  { %917 = shalt.err (!%p914_p2)
}
   0xb   :  { %s918_s8 = scalar_lea.vmem %s33_s22, 256  ;;  %p923_p4 = scmp.lt.s32.totalorder %s33_s22, %s33_s22 }
   0xc   :  { %p919_p3 = scmp.ne.s32.totalorder %s33_s22, %s918_s8  ;;  %p924_p5 = scmp.lt.s32.totalorder %s918_s8, %s918_s8 }
   0xe   :  { %p925_p6 = por %p924_p5, %p923_p4 }
  0x10   :  { %p926_p7 = pnand %p925_p6, %p919_p3 }
  0x12   :  { %929 = shalt.err (!%p926_p7)
}
  0x13   :  { %s1028_s9 = smov 64   ;;  %s1029_s10 = smov 4  }
  0x14   :  { %38 = dma.hbm_to_vmem [thread:$0]  %s1203_s1, 256, %s33_s22, [#allocation6], %s1028_s9, %s1028_s9, %s1029_s10  }
  0x15   :  { %s930_s15 = scalar_lea.hbm %s1202_s0, 128 }
  0x16   :  { %p931_p8 = scmp.ne.s32.totalorder %s1202_s0, %s930_s15  ;;  %p934_p9 = scmp.lt.u32.totalorder %s930_s15, %s1202_s0 }
  0x18   :  { %p936_p10 = pnand %p934_p9, %p931_p8 }
  0x1a   :  { %939 = shalt.err (!%p936_p10)
}
  0x1b   :  { %s940_s20 = scalar_lea.vmem %s1072_s24, 128  ;;  %p945_p12 = scmp.lt.s32.totalorder %s1072_s24, %s1072_s24 }
  0x1c   :  { %p941_p11 = scmp.ne.s32.totalorder %s1072_s24, %s940_s20  ;;  %p946_p13 = scmp.lt.s32.totalorder %s940_s20, %s940_s20 }
  0x1e   :  { %p947_p0 = por %p946_p13, %p945_p12 }
  0x20   :  { %p948_p1 = pnand %p947_p0, %p941_p11 }
  0x22   :  { %951 = shalt.err (!%p948_p1)
}
  0x23   :  { %26 = dma.hbm_to_vmem [thread:$0]  %s1202_s0, 128, %s1072_s24, [#allocation3], %s1028_s9, %s1028_s9, %s1029_s10  }
  0x24   :  { %s1030_s22 = smov [#allocation7]   ;;  %s952_s27 = scalar_lea.hbm %s1206_s4, 2048 }
  0x25   :  { %s48_s23 = sshll.u32 %s1030_s22, 4  ;;  %p953_p2 = scmp.ne.s32.totalorder %s1206_s4, %s952_s27  ;;  %s49_s23 = int_to_ptr.vmem [resolvable:$true] %s48_s23 }
  0x26   :  { %p956_p3 = scmp.lt.u32.totalorder %s952_s27, %s1206_s4 }
  0x28   :  { %p958_p4 = pnand %p956_p3, %p953_p2 }
  0x2a   :  { %961 = shalt.err (!%p958_p4)
}
  0x2b   :  { %s962_s8 = scalar_lea.vmem %s49_s23, 2048  ;;  %p967_p6 = scmp.lt.s32.totalorder %s49_s23, %s49_s23 }
  0x2c   :  { %p963_p5 = scmp.ne.s32.totalorder %s49_s23, %s962_s8  ;;  %p968_p7 = scmp.lt.s32.totalorder %s962_s8, %s962_s8 }
  0x2e   :  { %p969_p8 = por %p968_p7, %p967_p6 }
  0x30   :  { %p970_p9 = pnand %p969_p8, %p963_p5 }
  0x32   :  { %973 = shalt.err (!%p970_p9)
}
  0x33   :  { %s1031_s0 = smov 128   ;;  %s1032_s24 = smov 8  }
  0x34   :  { %54 = dma.hbm_to_vmem [thread:$0]  %s1206_s4, 2048, %s49_s23, [#allocation6], %s1031_s0, %s1031_s0, %s1032_s24  }
  0x35   :  { %s1033_s11 = smov [#allocation8]   ;;  %s974_s15 = scalar_lea.hbm %s1207_s5, 2048 }
  0x36   :  { %s60_s12 = sshll.u32 %s1033_s11, 4  ;;  %p975_p10 = scmp.ne.s32.totalorder %s1207_s5, %s974_s15  ;;  %s61_s12 = int_to_ptr.vmem [resolvable:$true] %s60_s12 }
  0x37   :  { %p978_p11 = scmp.lt.u32.totalorder %s974_s15, %s1207_s5 }
  0x39   :  { %p980_p12 = pnand %p978_p11, %p975_p10 }
  0x3b   :  { %983 = shalt.err (!%p980_p12)
}
  0x3c   :  { %s984_s20 = scalar_lea.vmem %s61_s12, 2048  ;;  %p989_p0 = scmp.lt.s32.totalorder %s61_s12, %s61_s12 }
  0x3d   :  { %p985_p13 = scmp.ne.s32.totalorder %s61_s12, %s984_s20  ;;  %p990_p1 = scmp.lt.s32.totalorder %s984_s20, %s984_s20 }
  0x3f   :  { %p991_p2 = por %p990_p1, %p989_p0 }
  0x41   :  { %p992_p3 = pnand %p991_p2, %p985_p13 }
  0x43   :  { %995 = shalt.err (!%p992_p3)
}
  0x44   :  { %66 = dma.hbm_to_vmem [thread:$0]  %s1207_s5, 2048, %s61_s12, [#allocation9], %s1031_s0, %s1031_s0, %s1032_s24  }
  0x45   :  { %1018 = dma.done.wait [#allocation3], 128  }
  0x46   :  { %1019 = vsyncadd [#allocation3], 4294967168 }
  0x47   :  { %1020 = dma.done.wait [#allocation6], 2304  }
  0x48   :  { %1021 = vsyncadd [#allocation6], 4294964992 }
  0x49   :  { %1022 = dma.done.wait [#allocation9], 2048  }
  0x4a   :  { %1023 = vsyncadd [#allocation9], 4294965248  ;;  %v1034_v0 = vmov 0.0   ;;  %vm1035_vm0 = vmmov 0   ;;  %v901_v1 = vld [vmem:[#allocation5] sm:$0xff]   ;;  %v902_v2 = vld [vmem:[#allocation5 + $0x8] sm:$0xff]  }
  0x4b   :  { %614 = vmatprep.subr.bf16.mxu0 %v1034_v0  ;;  %618 = vmatprep.mubr.msk.bf16.mxu0 %vm1035_vm0, %v1034_v0  ;;  %v148_v3 = vld [vmem:[#allocation7] sm:$0xff]  ;;  %v149_v4 = vld [vmem:[#allocation7 + $0x8] sm:$0xff]  ;;  %v150_v5 = vld [vmem:[#allocation7 + $0x10] sm:$0xff]  ;;  %vm103_vm1 = vcmask 261120   ;;  %s1036_s25 = smov [#allocation10]  }
  0x4c   :  { %615 = vmatpush3.bf16.msra.mxu0 %v901_v1  ;;  %v1133_v6 = vpack.c.bf16 %v149_v4, %v148_v3  ;;  %v151_v7 = vld [vmem:[#allocation7 + $0x18] sm:$0xff]  ;;  %v903_v8 = vld [vmem:[#allocation2] sm:$0xff]   ;;  %v152_v10 = vld [vmem:[#allocation7 + $0x20] sm:$0xff]  ;;  %s519_s26 = sshll.u32 %s1036_s25, 4  ;;  %s520_s26 = int_to_ptr.vmem [resolvable:$true] %s519_s26 }
  0x4d   :  { %616 = vmatprep.subr.bf16.mxu0 %v1034_v0  ;;  %v1135_v9 = vpack.c.bf16 %v151_v7, %v150_v5  ;;  %v153_v11 = vld [vmem:[#allocation7 + $0x28] sm:$0xff]  ;;  %v154_v13 = vld [vmem:[#allocation7 + $0x30] sm:$0xff]  ;;  %v155_v14 = vld [vmem:[#allocation7 + $0x38] sm:$0xff]  ;;  %p1001_p5 = scmp.lt.s32.totalorder %s520_s26, %s520_s26 }
  0x4e   :  { %763 = vmatprep.subr.bf16.mxu1 %v1133_v6  ;;  %v1140_v12 = vpack.c.bf16 %v153_v11, %v152_v10  ;;  %v1144_v15 = vpack.c.bf16 %v155_v14, %v154_v13  ;;  %v156_v16 = vld [vmem:[#allocation7 + $0x40] sm:$0xff]  ;;  %v157_v17 = vld [vmem:[#allocation7 + $0x48] sm:$0xff]  ;;  %v158_v19 = vld [vmem:[#allocation7 + $0x50] sm:$0xff] }
  0x4f   :  { %765 = vmatpush3.bf16.msra.mxu1 %v1133_v6  ;;  %v1148_v18 = vpack.c.bf16 %v157_v17, %v156_v16  ;;  %v159_v20 = vld [vmem:[#allocation7 + $0x58] sm:$0xff]  ;;  %v160_v22 = vld [vmem:[#allocation7 + $0x60] sm:$0xff]  ;;  %v161_v23 = vld [vmem:[#allocation7 + $0x68] sm:$0xff] }
  0x50   :  { %617 = vmatpush3.bf16.msra.mxu0 %v902_v2  ;;  %767 = vmatprep.subr.bf16.mxu1 %v1135_v9  ;;  %v1152_v21 = vpack.c.bf16 %v159_v20, %v158_v19  ;;  %v786_v24 = vpack.c.bf16 %v161_v23, %v160_v22  ;;  %v162_v25 = vld [vmem:[#allocation7 + $0x70] sm:$0xff]  ;;  %v163_v26 = vld [vmem:[#allocation7 + $0x78] sm:$0xff]  ;;  %v241_v28 = vld [vmem:[#allocation8] sm:$0xff] }
  0x51   :  { %v790_v27 = vpack.c.bf16 %v163_v26, %v162_v25  ;;  %v242_v29 = vld [vmem:[#allocation8 + $0x8] sm:$0xff]  ;;  %v243_v30 = vld [vmem:[#allocation8 + $0x10] sm:$0xff]  ;;  %v244_v32 = vld [vmem:[#allocation8 + $0x18] sm:$0xff] }
  0x52   :  { %v1158_v31 = vpack.c.bf16 %v242_v29, %v241_v28  ;;  %v1160_v33 = vpack.c.bf16 %v244_v32, %v243_v30  ;;  %v245_v34 = vld [vmem:[#allocation8 + $0x20] sm:$0xff]  ;;  %v246_v35 = vld [vmem:[#allocation8 + $0x28] sm:$0xff]  ;;  %v247_v37 = vld [vmem:[#allocation8 + $0x30] sm:$0xff] }
  0x53   :  { %619 = vmatmul.mubr.msk.bf16.vlgmr.msra.gmra.mrb[0].mxu0 %vm103_vm1, %v903_v8  ;;  %769 = vmatpush3.bf16.msra.mxu1 %v1135_v9  ;;  %v802_v36 = vpack.c.bf16 %v246_v35, %v245_v34  ;;  %v248_v38 = vld [vmem:[#allocation8 + $0x38] sm:$0xff]  ;;  %v249_v40 = vld [vmem:[#allocation8 + $0x40] sm:$0xff]  ;;  %v250_v41 = vld [vmem:[#allocation8 + $0x48] sm:$0xff] }
  0x54   :  { %771 = vmatprep.subr.bf16.mxu1 %v1140_v12  ;;  %795 = vmatprep.subr.bf16.mxu0 %v1158_v31  ;;  %v806_v39 = vpack.c.bf16 %v248_v38, %v247_v37  ;;  %v810_v42 = vpack.c.bf16 %v250_v41, %v249_v40  ;;  %v251_v43 = vld [vmem:[#allocation8 + $0x50] sm:$0xff]  ;;  %v252_v44 = vld [vmem:[#allocation8 + $0x58] sm:$0xff]  ;;  %v253_v46 = vld [vmem:[#allocation8 + $0x60] sm:$0xff] }
  0x55   :  { %797 = vmatpush3.bf16.msra.mxu0 %v1158_v31  ;;  %v814_v45 = vpack.c.bf16 %v252_v44, %v251_v43  ;;  %v254_v47 = vld [vmem:[#allocation8 + $0x68] sm:$0xff]  ;;  %v255_v53 = vld [vmem:[#allocation8 + $0x70] sm:$0xff]  ;;  %v256_v54 = vld [vmem:[#allocation8 + $0x78] sm:$0xff] }
  0x56   :  { %799 = vmatprep.subr.bf16.mxu0 %v1160_v33  ;;  %v818_v48 = vpack.c.bf16 %v254_v47, %v253_v46  ;;  %v822_v55 = vpack.c.bf16 %v256_v54, %v255_v53  ;;  %v537_v10 = vld [vmem:[%s1204_s2] ss:$0 sm:$0xff]  ;;  %s996_s2 = scalar_lea.vmem %s520_s26, 256 }
  0x57   :  { %773 = vmatpush3.bf16.msra.mxu1 %v1140_v12  ;;  %p997_p4 = scmp.ne.s32.totalorder %s520_s26, %s996_s2  ;;  %p1002_p6 = scmp.lt.s32.totalorder %s996_s2, %s996_s2 }
  0x58   :  { %775 = vmatprep.subr.bf16.mxu1 %v1144_v15 }
  0x59   :  { %801 = vmatpush3.bf16.msra.mxu0 %v1160_v33  ;;  %p1003_p7 = por %p1002_p6, %p1001_p5 }
  0x5a   :  { %803 = vmatprep.subr.bf16.mxu0 %v802_v36 }
  0x5b   :  { %777 = vmatpush3.bf16.msra.mxu1 %v1144_v15  ;;  %p1004_p8 = pnand %p1003_p7, %p997_p4 }
  0x5c   :  { %779 = vmatprep.subr.bf16.mxu1 %v1148_v18 }
  0x5d   :  { %805 = vmatpush3.bf16.msra.mxu0 %v802_v36 }
  0x5e   :  { %807 = vmatprep.subr.bf16.mxu0 %v806_v39 }
  0x5f   :  { %781 = vmatpush3.bf16.msra.mxu1 %v1148_v18 }
  0x60   :  { %783 = vmatprep.subr.bf16.mxu1 %v1152_v21 }
  0x61   :  { %809 = vmatpush3.bf16.msra.mxu0 %v806_v39 }
  0x62   :  { %811 = vmatprep.subr.bf16.mxu0 %v810_v42 }
  0x63   :  { %785 = vmatpush3.bf16.msra.mxu1 %v1152_v21 }
  0x64   :  { %787 = vmatprep.subr.bf16.mxu1 %v786_v24 }
  0x65   :  { %813 = vmatpush3.bf16.msra.mxu0 %v810_v42 }
  0x66   :  { %815 = vmatprep.subr.bf16.mxu0 %v814_v45 }
  0x67   :  { %789 = vmatpush3.bf16.msra.mxu1 %v786_v24 }
  0x68   :  { %791 = vmatprep.subr.bf16.mxu1 %v790_v27 }
  0x69   :  { %817 = vmatpush3.bf16.msra.mxu0 %v814_v45 }
  0x6a   :  { %819 = vmatprep.subr.bf16.mxu0 %v818_v48 }
  0x6b   :  { %793 = vmatpush3.bf16.msra.mxu1 %v790_v27 }
  0x6c   :  { %827 = vmatprep.subr.bf16.mxu1 %v1133_v6 }
  0x6d   :  { %821 = vmatpush3.bf16.msra.mxu0 %v818_v48 }
  0x6e   :  { %823 = vmatprep.subr.bf16.mxu0 %v822_v55 }
  0x71   :  { %825 = vmatpush3.bf16.msra.mxu0 %v822_v55 }
  0x72   :  { %859 = vmatprep.subr.bf16.mxu0 %v1158_v31 }
 0x126   :  { %v141_v49 = vpop.f32.mrb[0].mxu0 }
 0x127   :  { %v620_v50 = vpop.f32.mrb[1].mxu0  ;;  %654 = vmatprep.mubr.f32.mxu1 %v141_v49 }
 0x128   :  { %v144_v51 = vpop.f32.mrb[2].mxu0 }
 0x129   :  { %v621_v52 = vpop.f32.mrb[3].mxu0  ;;  %655 = vmatmul.mubr.f32.vlgmr.msra.gmra.mrb[0].mxu1 %v144_v51 }
 0x12a   :  { %829 = vmatpush3.bf16.msra.mxu1 %v1133_v6 }
 0x12b   :  { %831 = vmatprep.subr.bf16.mxu1 %v1135_v9 }
 0x12e   :  { %833 = vmatpush3.bf16.msra.mxu1 %v1135_v9 }
 0x12f   :  { %835 = vmatprep.subr.bf16.mxu1 %v1140_v12 }
 0x132   :  { %837 = vmatpush3.bf16.msra.mxu1 %v1140_v12 }
 0x133   :  { %839 = vmatprep.subr.bf16.mxu1 %v1144_v15 }
 0x136   :  { %841 = vmatpush3.bf16.msra.mxu1 %v1144_v15  ;;  %v538_v15 = vld [vmem:[%s1205_s3] ss:$0 sm:$0xff] }
 0x137   :  { %843 = vmatprep.subr.bf16.mxu1 %v1148_v18 }
 0x13a   :  { %845 = vmatpush3.bf16.msra.mxu1 %v1148_v18 }
 0x13b   :  { %847 = vmatprep.subr.bf16.mxu1 %v1152_v21 }
 0x13e   :  { %849 = vmatpush3.bf16.msra.mxu1 %v1152_v21 }
 0x13f   :  { %851 = vmatprep.subr.bf16.mxu1 %v786_v24 }
 0x142   :  { %853 = vmatpush3.bf16.msra.mxu1 %v786_v24 }
 0x143   :  { %855 = vmatprep.subr.bf16.mxu1 %v790_v27 }
 0x146   :  { %857 = vmatpush3.bf16.msra.mxu1 %v790_v27 }
 0x1fc   :  { %v656_v56 = vpop.f32.mrb[0].mxu1 }
 0x1fd   :  { %v230_v57 = vpop.f32.mrb[1].mxu1  ;;  %v240_v59 = vmul.f32 0.5, %v656_v56 }
 0x1fe   :  { %v239_v58 = vmul.f32 0.5, %v230_v57 }
 0x200   :  { %689 = vmatprep.mubr.f32.mxu0 %v239_v58 }
 0x201   :  { %690 = vmatmul.mubr.f32.vlgmr.msra.gmra.mrb[4].mxu0 %v240_v59 }
 0x202   :  { %861 = vmatpush3.bf16.msra.mxu0 %v1158_v31 }
 0x203   :  { %863 = vmatprep.subr.bf16.mxu0 %v1160_v33 }
 0x206   :  { %865 = vmatpush3.bf16.msra.mxu0 %v1160_v33 }
 0x207   :  { %867 = vmatprep.subr.bf16.mxu0 %v802_v36 }
 0x20a   :  { %869 = vmatpush3.bf16.msra.mxu0 %v802_v36 }
 0x20b   :  { %871 = vmatprep.subr.bf16.mxu0 %v806_v39 }
 0x20e   :  { %873 = vmatpush3.bf16.msra.mxu0 %v806_v39 }
 0x20f   :  { %875 = vmatprep.subr.bf16.mxu0 %v810_v42 }
 0x212   :  { %877 = vmatpush3.bf16.msra.mxu0 %v810_v42 }
 0x213   :  { %879 = vmatprep.subr.bf16.mxu0 %v814_v45 }
 0x216   :  { %881 = vmatpush3.bf16.msra.mxu0 %v814_v45 }
 0x217   :  { %883 = vmatprep.subr.bf16.mxu0 %v818_v48 }
 0x21a   :  { %885 = vmatpush3.bf16.msra.mxu0 %v818_v48 }
 0x21b   :  { %887 = vmatprep.subr.bf16.mxu0 %v822_v55 }
 0x21e   :  { %889 = vmatpush3.bf16.msra.mxu0 %v822_v55 }
 0x2d4   :  { %v691_v60 = vpop.f32.mrb[4].mxu0 }
 0x2d5   :  { %v333_v61 = vsub.f32 %v144_v51, %v691_v60  ;;  %v323_v62 = vpop.f32.mrb[5].mxu0 }
 0x2d6   :  { %v332_v63 = vsub.f32 %v141_v49, %v323_v62 }
 0x2d7   :  { %v335_v1 = vmul.f32 %v333_v61, %v333_v61 }
 0x2d8   :  { %v334_v0 = vmul.f32 %v332_v63, %v332_v63 }
 0x2da   :  { %724 = vmatprep.mubr.f32.mxu1 %v334_v0 }
 0x2db   :  { %725 = vmatmul.mubr.f32.vlgmr.msra.gmra.mrb[2].mxu1 %v335_v1 }
 0x3ae   :  { %v726_v2 = vpop.f32.mrb[2].mxu1 }
 0x3af   :  { %v402_v3 = vpop.f32.mrb[3].mxu1  ;;  %v412_v5 = vmul.f32 0.5, %v726_v2 }
 0x3b0   :  { %v411_v4 = vmul.f32 0.5, %v402_v3 }
 0x3b2   :  { %759 = vmatprep.mubr.f32.mxu0 %v411_v4 }
 0x3b3   :  { %760 = vmatmul.mubr.f32.vlgmr.msra.gmra.mrb[6].mxu0 %v412_v5 }
 0x486   :  { %v761_v6 = vpop.f32.mrb[6].mxu0 }
 0x487   :  { %v486_v7 = vadd.f32 1e-05, %v761_v6  ;;  %v480_v8 = vpop.f32.mrb[7].mxu0 }
 0x488   :  { %v481_v9 = vadd.f32 1e-05, %v480_v8 }
 0x489   :  { %904 = vrsqrt.f32 %v486_v7 }
 0x48a   :  { %906 = vrsqrt.f32 %v481_v9 }
 0x493   :  { %v905_v11 = vpop.eup %904 }
 0x494   :  { %v907_v12 = vpop.eup %906  ;;  %v498_v13 = vmul.f32 %v905_v11, %v537_v10 }
 0x495   :  { %v497_v14 = vmul.f32 %v907_v12, %v537_v10 }
 0x496   :  { %v500_v16 = vmul.f32 %v498_v13, %v333_v61 }
 0x497   :  { %v499_v17 = vmul.f32 %v497_v14, %v332_v63 }
 0x498   :  { %v509_v18 = vadd.f32 %v538_v15, %v500_v16 }
 0x499   :  { %v508_v19 = vadd.f32 %v538_v15, %v499_v17 }
 0x49a   :  { %v511_v20 = vmax.f32 %v509_v18, 0.0 }
 0x49b   :  { %v510_v21 = vmax.f32 %v508_v19, 0.0 }
 0x49c   :  { %513 = vst [vmem:[#allocation10 + $0x8] sm:$0xff] %v511_v20 }
 0x49d   :  { %512 = vst [vmem:[#allocation10] sm:$0xff] %v510_v21 }
 0x49e   :  { %1007 = shalt.err (!%p1004_p8)
}
 0x49f   :  { %s1008_s28 = scalar_lea.hbm %s1208_s6, 256 }
 0x4a0   :  { %p1009_p9 = scmp.ne.s32.totalorder %s1208_s6, %s1008_s28  ;;  %p1012_p10 = scmp.lt.u32.totalorder %s1008_s28, %s1208_s6 }
 0x4a2   :  { %p1014_p11 = pnand %p1012_p10, %p1009_p9 }
 0x4a4   :  { %1017 = shalt.err (!%p1014_p11)
}
 0x4a5   :  { %525 = dma.vmem_to_hbm [thread:$0]  %s520_s26, 256, %s1208_s6, [#allocation4], %s1031_s0, %s1031_s0, %s1032_s24  }
 0x4a6   :  { %1024 = dma.done.wait [#allocation4], 256  }
 0x4a7   :  { %1025 = vsyncadd [#allocation4], 4294967040 }
 0x4a8   :  { %529 = vsyncpa [#allocation3], 1 }
 0x4a9   :  { %530 = vsyncpa [#allocation6], 1 }
 0x4aa   :  { %531 = vsyncpa [#allocation9], 1 }
 0x4ab   :  { %532 = vsyncpa [#allocation4], 1 }

</bundles_post_ra>
